<compile_context>
chip_gen: v7x
topology: tpu7x:2x2x1
jax: 0.10.0
libtpu: 0.0.40
codegen_flags: <defaults>
</compile_context>

<pallas_src>
import jax
import jax.numpy as jnp
from jax.experimental import pallas as pl
from jax.experimental.pallas import tpu as pltpu


def _deform_kernel(ptsT_ref, wT_ref, mat_ref, outT_ref):
    # ptsT_ref: (3,  TV)   xyz of the points, V on lanes
    # wT_ref  : (Nn, TV)   skinning weights, V on lanes
    # mat_ref : (16, Nn)   per-node transforms; row r = 4*i + j holds M[n][j, i]
    # outT_ref: (4,  TV)   deformed homogeneous points, V on lanes
    w = wT_ref[...].astype(jnp.float32)                     # (Nn, TV), f32 accum path
    m = mat_ref[...].astype(jnp.float32)                    # (16, Nn)

    # wm[4*i + j, v] = sum_n M[n][j, i] * w[n, v]  == Mv[v][j, i]
    # Nn is tiny (K=8): the single small matmul is nowhere near the roofline of this
    # HBM-bound kernel, so the MXU path is fine (pad Nn to 128 only if it grows large).
    wm = jnp.dot(m, w, preferred_element_type=jnp.float32)  # (16, TV)

    p = ptsT_ref[...].astype(jnp.float32)                   # (3, TV)
    # out[j, :] = p0*wm[0+j] + p1*wm[4+j] + p2*wm[8+j] + wm[12+j]   (hom w-coord == 1)
    acc = p[0:1, :] * wm[0:4, :]
    acc = acc + p[1:2, :] * wm[4:8, :]
    acc = acc + p[2:3, :] * wm[8:12, :]
    acc = acc + wm[12:16, :]
    outT_ref[...] = acc.astype(outT_ref.dtype)


def compute_transmat(nodes, nodes_R, nodes_t):
    """Standard embedded-deformation per-node 4x4 transform: p -> R @ (p - g) + g + t."""
    n = nodes.shape[0]
    trans = nodes + nodes_t - jnp.einsum("nij,nj->ni", nodes_R, nodes)      # (Nn, 3)
    top = jnp.concatenate([nodes_R, trans[:, :, None]], axis=-1)            # (Nn, 3, 4)
    bottom = jnp.broadcast_to(
        jnp.array([[0.0, 0.0, 0.0, 1.0]], dtype=nodes.dtype)[None], (n, 1, 4)
    )
    return jnp.concatenate([top, bottom], axis=1)                           # (Nn, 4, 4)


def _round_up(x, m):
    return (x + m - 1) // m * m


def embedded_deform_forward(points, node, node_rotation, node_offset, weights,
                            *, tile_v=4096, weights_dtype=None):
    """Pallas implementation of EmbeddedDeform.forward. Returns (V, 4) homogeneous pts."""
    pts = points.reshape(-1, points.shape[-1])
    pts_v = pts[:, :3]
    V = pts_v.shape[0]
    Nn = node.shape[0]

    # ---- host-side glue (layout plumbing only; no hom concatenate is built) ----
    mats = compute_transmat(node, node_rotation, node_offset)               # (Nn, 4, 4)
    # mat[4*i + j, n] = mats[n, j, i]
    mat = jnp.transpose(mats, (2, 1, 0)).reshape(16, Nn).astype(jnp.float32)

    ptsT = pts_v.T                                                          # (3, V)
    wT = weights.T                                                          # (Nn, V)
    if weights_dtype is not None:
        wT = wT.astype(weights_dtype)   # e.g. bf16: halves the dominant HBM stream

    # ---- lane tile selection: multiple of 128, as large as useful, >=2 grid steps ----
    tv = min(tile_v, _round_up(V, 128))
    tv = max(128, (tv // 128) * 128)
    if _round_up(V, tv) // tv < 2 and V > 128:
        tv = max(128, (tv // 2 // 128) * 128)   # keep both v7x TensorCores busy
    V_pad = _round_up(V, tv)
    if V_pad != V:
        ptsT = jnp.pad(ptsT, ((0, 0), (0, V_pad - V)))
        wT = jnp.pad(wT, ((0, 0), (0, V_pad - V)))

    grid = (V_pad // tv,)
    outT = pl.pallas_call(
        _deform_kernel,
        out_shape=jax.ShapeDtypeStruct((4, V_pad), pts_v.dtype),
        grid_spec=pltpu.PrefetchScalarGridSpec(
            num_scalar_prefetch=0,
            grid=grid,
            in_specs=[
                pl.BlockSpec((3, tv), lambda i: (0, i)),    # points, lane-dense
                pl.BlockSpec((Nn, tv), lambda i: (0, i)),   # weights, lane-dense
                pl.BlockSpec((16, Nn), lambda i: (0, 0)),   # node transforms, resident
            ],
            out_specs=pl.BlockSpec((4, tv), lambda i: (0, i)),  # lane-dense stores
        ),
        compiler_params=pltpu.CompilerParams(
            dimension_semantics=("parallel",),
        ),
    )(ptsT, wT, mat)

    return outT[:, :V].T                                                    # (V, 4)


def _reference_forward(points, node, node_rotation, node_offset, weights):
    pts = points.reshape(-1, points.shape[-1])
    pts_v = pts[:, :3]
    mats = compute_transmat(node, node_rotation, node_offset)               # (Nn,4,4)
    verts_mat = jnp.einsum("vn,nij->vij", weights, mats)                    # (V,4,4)
    hom = jnp.concatenate([pts_v, jnp.ones((pts_v.shape[0], 1), pts_v.dtype)], axis=-1)
    return jnp.einsum("ni,nji->nj", hom, verts_mat)                         # (V,4)


if __name__ == "__main__":
    key = jax.random.PRNGKey(0)
    k_pts, k_node, k_rot, k_off, k_w = jax.random.split(key, 5)

    B, P, C = 2, 128, 3          # points: (2, 128, 3) -> V = 256
    Nn = 8                       # deformation graph nodes

    points = jax.random.normal(k_pts, (B, P, C), dtype=jnp.float32)
    node = jax.random.normal(k_node, (Nn, 3), dtype=jnp.float32)
    # near-identity rotations (orthogonality not required by the math)
    node_rotation = (jnp.eye(3, dtype=jnp.float32)[None]
                     + 0.1 * jax.random.normal(k_rot, (Nn, 3, 3), dtype=jnp.float32))
    node_offset = 0.05 * jax.random.normal(k_off, (Nn, 3), dtype=jnp.float32)
    weights = jax.nn.softmax(jax.random.normal(k_w, (B * P, Nn), dtype=jnp.float32), axis=-1)

    ref = _reference_forward(points, node, node_rotation, node_offset, weights)

    # f32 weights path: exact semantics of the module
    out = embedded_deform_forward(points, node, node_rotation, node_offset, weights)
    out = jax.block_until_ready(out)
    assert out.shape == (B * P, 4)
    assert jnp.allclose(out, ref, atol=1e-4, rtol=1e-4), "mismatch vs. reference (f32)"

    # bf16 weights path: halves the dominant HBM stream (v6e/v7x recommendation);
    # accumulation stays in f32 inside the kernel, so only weight quantization error remains.
    out_bf16 = embedded_deform_forward(points, node, node_rotation, node_offset, weights,
                                       weights_dtype=jnp.bfloat16)
    out_bf16 = jax.block_until_ready(out_bf16)
    assert jnp.allclose(out_bf16, ref, atol=5e-2, rtol=5e-2), "mismatch vs. reference (bf16 weights)"

    print("KERNEL_OK")
</pallas_src>

<mosaic_0001>
module attributes {stable_mosaic.version = 11 : i64} {
  func.func @_deform_kernel(%arg0: i32, %arg1: memref<3x128xf32, #tpu.memory_space<vmem>>, %arg2: memref<8x128xf32, #tpu.memory_space<vmem>>, %arg3: memref<16x8xf32, #tpu.memory_space<vmem>>, %arg4: memref<4x128xf32, #tpu.memory_space<vmem>>) attributes {dimension_semantics = [#tpu.dimension_semantics<parallel>], iteration_bounds = array<i64: 2>, scalar_prefetch = 0 : i64, scratch_operands = 0 : i64, tpu.core_type = #tpu.core_type<tc>, window_params = [{transform_indices = @transform_0, window_bounds = array<i64: 3, 128>}, {transform_indices = @transform_1, window_bounds = array<i64: 8, 128>}, {pipeline_mode = #tpu.pipeline_mode<synchronous>, transform_indices = @transform_2, window_bounds = array<i64: 16, 8>}, {transform_indices = @transform_3, window_bounds = array<i64: 4, 128>}]} {
    %c0 = arith.constant 0 : index
    %c0_0 = arith.constant 0 : index
    %0 = vector.load %arg2[%c0, %c0_0] : memref<8x128xf32, #tpu.memory_space<vmem>>, vector<8x128xf32>
    %c0_1 = arith.constant 0 : index
    %c0_2 = arith.constant 0 : index
    %1 = vector.load %arg3[%c0_1, %c0_2] : memref<16x8xf32, #tpu.memory_space<vmem>>, vector<16x8xf32>
    %cst = arith.constant dense<0.000000e+00> : vector<16x128xf32>
    %2 = tpu.matmul %1, %0, %cst {dimension_numbers = #tpu.dot_dimension_numbers<[1], [0], [0], [1], [0, 0, 1, 1], [], []>} : vector<16x8xf32>, vector<8x128xf32>, vector<16x128xf32> -> vector<16x128xf32>
    %c0_3 = arith.constant 0 : index
    %c0_4 = arith.constant 0 : index
    %3 = vector.load %arg1[%c0_3, %c0_4] : memref<3x128xf32, #tpu.memory_space<vmem>>, vector<3x128xf32>
    %4 = vector.extract_strided_slice %3 {offsets = [0, 0], sizes = [1, 128], strides = [1, 1]} : vector<3x128xf32> to vector<1x128xf32>
    %5 = vector.extract_strided_slice %2 {offsets = [0, 0], sizes = [4, 128], strides = [1, 1]} : vector<16x128xf32> to vector<4x128xf32>
    %6 = vector.broadcast %4 : vector<1x128xf32> to vector<4x128xf32>
    %7 = arith.mulf %6, %5 : vector<4x128xf32>
    %8 = vector.extract_strided_slice %3 {offsets = [1, 0], sizes = [1, 128], strides = [1, 1]} : vector<3x128xf32> to vector<1x128xf32>
    %9 = vector.extract_strided_slice %2 {offsets = [4, 0], sizes = [4, 128], strides = [1, 1]} : vector<16x128xf32> to vector<4x128xf32>
    %10 = vector.broadcast %8 : vector<1x128xf32> to vector<4x128xf32>
    %11 = arith.mulf %10, %9 : vector<4x128xf32>
    %12 = arith.addf %7, %11 : vector<4x128xf32>
    %13 = vector.extract_strided_slice %3 {offsets = [2, 0], sizes = [1, 128], strides = [1, 1]} : vector<3x128xf32> to vector<1x128xf32>
    %14 = vector.extract_strided_slice %2 {offsets = [8, 0], sizes = [4, 128], strides = [1, 1]} : vector<16x128xf32> to vector<4x128xf32>
    %15 = vector.broadcast %13 : vector<1x128xf32> to vector<4x128xf32>
    %16 = arith.mulf %15, %14 : vector<4x128xf32>
    %17 = arith.addf %12, %16 : vector<4x128xf32>
    %18 = vector.extract_strided_slice %2 {offsets = [12, 0], sizes = [4, 128], strides = [1, 1]} : vector<16x128xf32> to vector<4x128xf32>
    %19 = arith.addf %17, %18 : vector<4x128xf32>
    %c0_5 = arith.constant 0 : index
    %c0_6 = arith.constant 0 : index
    %20 = vector.load %arg4[%c0_5, %c0_6] : memref<4x128xf32, #tpu.memory_space<vmem>>, vector<4x128xf32>
    tpu.vector_store %arg4[%c0_5, %c0_6], %19 {strides = array<i32>} : memref<4x128xf32, #tpu.memory_space<vmem>>, vector<4x128xf32>,
    return
  }
  func.func @transform_0(%arg0: i32) -> (i32, i32) {
    %c0_i32 = arith.constant 0 : i32
    %c0_i32_0 = arith.constant 0 : i32
    return %c0_i32, %arg0 : i32, i32
  }
  func.func @transform_1(%arg0: i32) -> (i32, i32) {
    %c0_i32 = arith.constant 0 : i32
    %c0_i32_0 = arith.constant 0 : i32
    return %c0_i32, %arg0 : i32, i32
  }
  func.func @transform_2(%arg0: i32) -> (i32, i32) {
    %c0_i32 = arith.constant 0 : i32
    %c0_i32_0 = arith.constant 0 : i32
    %c0_i32_1 = arith.constant 0 : i32
    return %c0_i32, %c0_i32_0 : i32, i32
  }
  func.func @transform_3(%arg0: i32) -> (i32, i32) {
    %c0_i32 = arith.constant 0 : i32
    %c0_i32_0 = arith.constant 0 : i32
    return %c0_i32, %arg0 : i32, i32
  }
}

</mosaic_0001>

<bundles_post_ra>
// kernel: tpu_custom_call.1
= control target key start
LH: loop header
LB: loop body
LE: loop exit
PB: predicated region body
PF: predicated region fallthrough
CT: control target
= control target key end

     0   :  { %8 = vsyncpa [#allocation3], 0  ;;  %s633_s0 = inlined_call_operand.vmem [shape: f32[3,256], index: 0, kind: input, shape index: {}]   ;;  %s634_s1 = inlined_call_operand.vmem [shape: f32[8,256], index: 1, kind: input, shape index: {}]   ;;  %s635_s2 = inlined_call_operand.vmem [shape: f32[16,8], index: 2, kind: input, shape index: {}]   ;;  %s636_s3 = inlined_call_operand.hbm [shape: f32[4,256], index: 3, kind: output, shape index: {}]  }
   0x1   :  { %10 = vsyncpa [#allocation3 + $0x1], 0  ;;  %s524_s12 = smov 0   ;;  %s526_s13 = smov 0  }
   0x2   :  { %s528_s14 = smov 0   ;;  %s530_s15 = smov 0  }
   0x3 LB: > { %s545_s16 = sadd.s32 4294967295, %s501_s15   ;;  %s379_s17 = sadd.s32 4294967294, %s501_s15   ;;  %s501_s15 = sphi %s530_s15, %s642_s15   ;;  %s497_s14 = sphi %s528_s14, %s641_s14   ;;  %s493_s13 = sphi %s526_s13, %s640_s13   ;;  %s489_s12 = sphi %s524_s12, %s639_s12  }
   0x4   : > { %s549_s18 = sadd.s32 1, %s501_s15   ;;  %s96_s19 = sadd.s32 1, %s497_s14 }
   0x5   : > { %s93_s20 = ssub.s32 %s501_s15, %s549_s18  ;;  %p106_p0 = scmp.ne.s32.totalorder %s497_s14, %s493_s13 }
   0x6   : > { %p94_p1 = scmp.eq.s32.totalorder %s93_s20, 0  ;;  %p107_p2 = scmp.eq.s32.totalorder %s545_s16, 1 }
   0x7   : > { %p112_p3 = scmp.ne.s32.totalorder %s493_s13, %s489_s12  ;;  %p113_p4 = scmp.eq.s32.totalorder %s379_s17, 1 }
   0x8   : > { %s560_s21 = scalar_select %p94_p1, %s497_s14, %s96_s19  }
   0x9   : > { %p562_p5 = por %p107_p2, %p106_p0  ;;  %p566_p6 = por %p113_p4, %p112_p3 }
   0xa   : > { %p382_p7 = scmp.ge.s32.totalorder %s501_s15, 1  ;;  %p148_p8 = scmp.lt.s32.totalorder %s501_s15, 3 }
   0xc   : > { %p149_p9 = pnand %p382_p7, %p148_p8 }
   0xd   : > { %p175_p10 = scmp.lt.s32.totalorder (!%p149_p9), %s545_s16, 1  ;;  %v184_v0 = vld [vmem:[%s635_s2] sm:$0xff] (!%p149_p9)  ;;  %vm186_vm0 = vcmask (!%p149_p9), 64512   ;;  %v185_v2 = vld [vmem:[%s635_s2 + $0x8] sm:$0xff] (!%p149_p9)  ;;  %v269_v3 = vlaneseq (!%p149_p9)  ;;  %s172_s10 = sand.u32 (!%p149_p9), 1, %s493_s13  }
   0xe   : > { %152 = sbr.rel (%p149_p9) target bundleno = 265 (0x109), region = 32  ;;  %397 = vmatprep.mubr.msk.f32.mxu0 (!%p149_p9), %vm186_vm0, %v184_v0  ;;  %s383_s11 = sshll.u32 (!%p149_p9), %s172_s10, 2 }
   0xf   : > { %v270_v4 = vshrl.u32 (!%p149_p9), %v269_v3, 7  ;;  %s389_s17 = sshll.u32 (!%p149_p9), %s545_s16, 6  ;;  %s174_s19 = scalar_lea.vmem (!%p149_p9), [#allocation2], %s383_s11 }
  0x10   : > { %s308_s20 = sshll.u32 (!%p149_p9), %s174_s19, 4  ;;  %s593_s20 = int_to_ptr.vmem [resolvable:$true] %s308_s20 }
  0x11   : > { %v285_v5 = vsub.s32 (!%p149_p9), 2, %v270_v4  ;;  %v271_v7 = vsub.s32 (!%p149_p9), 0, %v270_v4  ;;  %v276_v8 = vsub.s32 (!%p149_p9), 1, %v270_v4  ;;  %s439_s28 = scalar_lea.vmem (!%p149_p9), %s593_s20, 64 }
  0x12   : > { %p440_p11 = scmp.ne.s32.totalorder (!%p149_p9), %s593_s20, %s439_s28 }
  0x14   : > { %p441_p12 = pnand (!%p149_p9), %p440_p11, %p562_p5 }
  0x15   : > { %s176_s26 = scalar_select %p175_p10, %s545_s16, 1 }
  0x16   : > { %p442_p13 = pneg %p441_p12  ;;  %s503_s16 = smov [#allocation2]  }
  0x17   : > { %s385_s27 = sshll.u32 %s176_s26, 3  ;;  %s384_s6 = sshll.u32 %s176_s26, 2 }
  0x18   : > { %s182_s30 = scalar_lea.vmem %s634_s1, %s385_s27  ;;  %s178_s9 = scalar_lea.vmem %s633_s0, %s384_s6 }
  0x19   : > { %v183_v1 = vld [vmem:[%s182_s30] sm:$0xff]  ;;  %s591_s26 = scalar_lea.hbm %s636_s3, %s389_s17  ;;  %s295_s27 = scalar_lea.sflag [#allocation3], %s172_s10 }
  0x1a   : > { %395 = vmatprep.subr.mxu0 %v183_v1  ;;  %v268_v6 = vld [vmem:[%s178_s9] sm:$0x7]  ;;  %s443_s29 = sshll.u32 %s503_s16, 4  ;;  %s444_s29 = int_to_ptr.vmem [resolvable:$false] %s443_s29 }
  0x1b   : > { %396 = vmatpush3.msra.mxu0 %v183_v1  ;;  %v286_v9 = vrot.slane %v268_v6, %v285_v5  ;;  %v272_v10 = vrot.slane %v268_v6, %v271_v7  ;;  %v277_v11 = vrot.slane %v268_v6, %v276_v8  ;;  %s445_s30 = scalar_lea.vmem %s444_s29, 128  ;;  %p446_p0 = scmp.lt.s32.totalorder %s593_s20, %s444_s29 }
  0x1c   : > { %398 = vmatmul.mubr.msk.f32.vlgmr.msra.gmra.mrb[0].mxu0 %vm186_vm0, %v185_v2  ;;  %p447_p1 = scmp.lt.s32.totalorder %s445_s30, %s439_s28 }
  0x1e   : > { %p448_p2 = por %p447_p1, %p446_p0 }
  0x20   : > { %p449_p3 = pnand %p448_p2, %p442_p13 }
  0xef   : > { %v399_v12 = vpop.f32.mrb[0].mxu0 }
  0xf0   : > { %v287_v13 = vmul.f32 %v399_v12, %v286_v9  ;;  %v259_v14 = vpop.f32.mrb[1].mxu0  ;;  %v290_v19 = vrot.slane %v399_v12, 4 }
  0xf1   : > { %v273_v15 = vmul.f32 %v272_v10, %v259_v14  ;;  %v278_v16 = vmul.f32 %v277_v11, %v259_v14 }
  0xf3   : > { %v280_v17 = vrot.slane %v278_v16, 4 }
  0xf5   : > { %v282_v18 = vadd.f32 %v280_v17, %v273_v15 }
  0xf7   : > { %v288_v20 = vadd.f32 %v287_v13, %v282_v18 }
  0xf9   : > { %v292_v21 = vadd.f32 %v290_v19, %v288_v20 }
  0xfb   : > { %293 = vst [vmem:[%s174_s19] sm:$0xf] %v292_v21 }
  0xfc   : > { %452 = shalt.err (!%p449_p3)
}
  0xfd   : > { %s453_s4 = scalar_lea.hbm %s591_s26, 64  ;;  %s457_s7 = scalar_lea.hbm %s636_s3, 128 }
  0xfe   : > { %p454_p4 = scmp.ne.s32.totalorder %s591_s26, %s453_s4  ;;  %p458_p9 = scmp.lt.u32.totalorder %s591_s26, %s636_s3 }
  0xff   : > { %p459_p10 = scmp.lt.u32.totalorder %s457_s7, %s453_s4  ;;  %p461_p12 = scmp.lt.u32.totalorder %s453_s4, %s591_s26 }
 0x100   : > { %p455_p7 = pnand %p454_p4, %p562_p5 }
 0x101   : > { %p460_p11 = por %p459_p10, %p458_p9 }
 0x102   : > { %p456_p8 = pneg %p455_p7 }
 0x103   : > { %p462_p13 = por %p461_p12, %p460_p11 }
 0x105   : > { %p463_p0 = pnand %p462_p13, %p456_p8 }
 0x107   : > { %466 = shalt.err (!%p463_p0)
}
 0x108   : > { %400 = dma.vmem_to_hbm [thread:$0]  (%p562_p5), %s593_s20, 64, %s591_s26, %s295_s27  }
 0x109 PF: > { %p406_p1 = scmp.ge.s32.totalorder %s501_s15, 2  ;;  %s320_s10 = sand.u32 1, %s489_s12  }
 0x10a   : > { %s321_s11 = scalar_lea.sflag [#allocation3], %s320_s10 }
 0x10b   : > { %p403_p2 = pnand %p406_p1, %p566_p6 }
 0x10d   : > { %484 = dma.done.wait (!%p403_p2), %s321_s11, 64  }
 0x10e   : > { %486 = vsyncadd (!%p403_p2), %s321_s11, 4294967232  ;;  %p13_p3 = scmp.ge.s32.totalorder %s549_s18, 4   ;;  %s639_s12 = smov %s493_s13 }
 0x10f   : > { %s640_s13 = smov %s497_s14  ;;  %s641_s14 = smov %s560_s21 }
 0x110   : > { %s642_s15 = smov %s549_s18  ;;  %15 = sbr.rel (!%p13_p3) target bundleno = 3 (0x3), region = 70 }
 0x117   :  { %326 = vsyncpa [#allocation3], 1 }
 0x118   :  { %328 = vsyncpa [#allocation3 + $0x1], 1 }

</bundles_post_ra>
